<compile_context>
chip_gen: v7x
topology: tpu7x:2x2x1
jax: 0.10.0
libtpu: 0.0.40
codegen_flags: <defaults>
</compile_context>

<pallas_src>
import functools

import numpy as np
import jax
import jax.numpy as jnp
from jax.experimental import pallas as pl
from jax.experimental.pallas import tpu as pltpu


_LANE = 128          # final logits are stored 128-lane wide (lane-dense vst)
_SUBLANE = 8
_BN_EPS = 1e-5       # PyTorch BatchNorm2d default


# ---------------------------------------------------------------------------
# Fused forward kernel: one grid step per batch block (grid has 1 or 2 steps).
# ---------------------------------------------------------------------------

def _network_kernel(*refs, n_conv, n_enc, gcn_taps, n_act, epi_slices):
    x_ref, st_ref, epi_ref = refs[0], refs[1], refs[2]
    w_refs = refs[3:-1]
    out_ref = refs[-1]

    wcur = [0]

    def next_w():
        r = w_refs[wcur[0]]
        wcur[0] += 1
        return r

    ecur = [0]

    def next_e():
        off, width = epi_slices[ecur[0]]
        ecur[0] += 1
        return epi_ref[:, off:off + width]            # (1, width) f32, static slice

    def mm(a, w_ref):
        # bf16 MXU operands, f32 accumulation; epilogues stay in f32.
        return jnp.dot(a.astype(jnp.bfloat16), w_ref[...],
                       preferred_element_type=jnp.float32)

    # --- per-agent CNN encoder: each conv+BN(eval)+ReLU is ONE dense matmul
    #     (conv pre-lowered to a Toeplitz matrix with the BN scale folded into
    #     its columns); only the BN/bias shift add remains in the epilogue. ---
    h = x_ref[...]                                     # (M, Cin*H*W) bf16
    for _ in range(n_conv):
        h = jnp.maximum(mm(h, next_w()) + next_e(), 0.0)

    # --- compress MLP (bias-only epilogue) ---
    for _ in range(n_enc):
        h = jnp.maximum(mm(h, next_w()) + next_e(), 0.0)

    # --- graph filter layers, node-major rows = (batch, agent), F on lanes.
    #     st_ref is the block-diagonal S^T for this grid block's batch slice,
    #     so ONE small f32 matmul propagates every batch element per hop; the
    #     K taps are concatenated on the lane axis so each GCN layer is ONE
    #     matmul with a 128/192-deep contraction. ---
    st = st_ref[...]                                   # (M, M) f32 block-diag S^T
    for taps in gcn_taps:
        w_cat = next_w()                               # (taps*F_in, F_out) bf16
        z = h
        zs = [z]
        for _ in range(1, taps):
            z = jnp.dot(st, z, preferred_element_type=jnp.float32)   # f32 hop
            zs.append(z)
        zcat = zs[0] if taps == 1 else jnp.concatenate(zs, axis=-1)
        h = jnp.maximum(mm(zcat, w_cat) + next_e(), 0.0)   # GCN + trailing ReLU

    # --- action MLP (last layer zero-padded to a lane-dense 128 width) ---
    for l in range(n_act):
        h = mm(h, next_w()) + next_e()
        if l < n_act - 1:
            h = jnp.maximum(h, 0.0)

    out_ref[...] = h.astype(out_ref.dtype)


def network_forward_pallas(prep, states, gso):
    """states: (B, A, C, H, W) f32, gso: (B, A, A) f32 -> (B, A, num_actions)."""
    B, A, C, H, W = states.shape
    M = B * A

    # Batch folded into the matmul M dimension.  Use 2 "parallel" grid blocks
    # (v7x megacore) only when each block still fills whole 8-row sublanes;
    # otherwise a single grid step (v5e/v6e, and the B=2/A=4 case -> M=8).
    if B % 2 == 0 and ((B // 2) * A) % _SUBLANE == 0:
        bb = B // 2
    else:
        bb = B
    nblk = B // bb
    Mb = bb * A

    # (C, H, W) flatten order == PyTorch's features.reshape(B, -1)
    x = states.reshape(M, C * H * W).astype(jnp.bfloat16)

    # Block-diagonal S^T per grid block, rows/cols ordered (batch, agent).
    gso_t = jnp.transpose(gso, (0, 2, 1)).astype(jnp.float32)
    gso_t = gso_t.reshape(nblk, bb, A, A)
    eye_bb = jnp.eye(bb, dtype=jnp.float32)
    st_blk = jnp.einsum("pq,spij->spiqj", eye_bb, gso_t).reshape(nblk, Mb, Mb)

    weights = prep["weights"]
    epi = prep["epilogues"]

    kernel = functools.partial(
        _network_kernel,
        n_conv=prep["n_conv"], n_enc=prep["n_enc"],
        gcn_taps=prep["gcn_taps"], n_act=prep["n_act"],
        epi_slices=prep["epi_slices"])

    # NOTE: weight block indices never change across the (<=2 step) grid and
    # the matrices are tiny at 5x5 maps, so default buffering is left alone;
    # for larger maps single-buffer them and/or switch the conv lowering to
    # in-kernel im2col (dense Toeplitz scales as (HW)^2, v7x VMEM is 64 MiB).
    in_specs = [
        pl.BlockSpec((Mb, x.shape[-1]), lambda g: (g, 0)),
        pl.BlockSpec((None, Mb, Mb), lambda g: (g, 0, 0)),
        pl.BlockSpec(epi.shape, lambda g: (0, 0)),
    ] + [pl.BlockSpec(w.shape, lambda g: (0, 0)) for w in weights]

    out = pl.pallas_call(
        kernel,
        out_shape=jax.ShapeDtypeStruct((M, _LANE), jnp.float32),
        grid=(nblk,),
        in_specs=in_specs,
        out_specs=pl.BlockSpec((Mb, _LANE), lambda g: (g, 0)),
        compiler_params=pltpu.CompilerParams(
            dimension_semantics=("parallel",)),
    )(x, st_blk, epi, *weights)

    return out[:, :prep["num_actions"]].reshape(B, A, prep["num_actions"])


# ---------------------------------------------------------------------------
# One-time parameter preparation (outside jit).
# ---------------------------------------------------------------------------

def _conv_as_dense_matrix(w, H, W):
    """Lower a 3x3/stride1/pad1 Conv2d weight (Cout, Cin, 3, 3) to a dense
    (Cin*H*W, Cout*H*W) matrix acting on (C,H,W)-flattened activations."""
    Cout, Cin, kh, kw = w.shape
    HW = H * W
    T = np.zeros((kh, kw, HW, HW), np.float32)
    for io in range(H):
        for jo in range(W):
            po = io * W + jo
            for dy in range(kh):
                for dx in range(kw):
                    ii, ji = io + dy - 1, jo + dx - 1
                    if 0 <= ii < H and 0 <= ji < W:
                        T[dy, dx, ii * W + ji, po] = 1.0
    big = jnp.einsum("ocyx,yxpq->cpoq", w, jnp.asarray(T))
    return big.reshape(Cin * HW, Cout * HW)


def _pack_epilogues(vectors):
    """Concatenate small f32 vectors into one (1, N_total) array, each padded
    to a 128-lane multiple so every static slice starts lane-aligned."""
    offsets = []
    padded = []
    cursor = 0
    for v in vectors:
        v = jnp.asarray(v, jnp.float32)
        n = int(v.shape[0])
        offsets.append((cursor, n))
        npad = (-n) % _LANE
        padded.append(jnp.pad(v, (0, npad)))
        cursor += n + npad
    pack = jnp.concatenate(padded)[None, :]            # (1, N_total) f32
    return pack, tuple(offsets)


def prepare_params(params, config):
    """Lower convs to dense matrices with BN scale folded into the columns,
    concatenate GCN taps along the contraction axis, transpose linears, pad
    the action head to a lane multiple, pack all epilogue vectors into one
    array, and cast MXU operands to bf16."""
    H, W = config["map_shape"]
    HW = H * W
    weights = []
    epi_vecs = []

    for (w, b, gamma, beta, mean, var) in params["convs"]:
        big = _conv_as_dense_matrix(w, H, W)                       # f32
        scale = gamma / jnp.sqrt(var + _BN_EPS)
        shift = (b - mean) * scale + beta
        big = big * jnp.repeat(scale, HW)[None, :]                 # fold BN scale (f32)
        weights.append(big.astype(jnp.bfloat16))
        epi_vecs.append(jnp.repeat(shift, HW))                     # shift-only epilogue

    for (w, b) in params["encoder"]:
        weights.append(w.T.astype(jnp.bfloat16))
        epi_vecs.append(b)

    gcn_taps = []
    for (w, b) in params["gcn"]:                 # w (K, F_out, F_in), b (F_out, 1)
        K, F_out, F_in = int(w.shape[0]), int(w.shape[1]), int(w.shape[2])
        gcn_taps.append(K)
        w_cat = jnp.transpose(w, (0, 2, 1)).reshape(K * F_in, F_out)
        weights.append(w_cat.astype(jnp.bfloat16))
        epi_vecs.append(b[:, 0])

    n_act = len(params["action"])
    num_actions = int(params["action"][-1][0].shape[0])
    for i, (w, b) in enumerate(params["action"]):
        wt = w.T.astype(jnp.float32)
        bvec = b.astype(jnp.float32)
        if i == n_act - 1:
            assert wt.shape[1] <= _LANE
            pad = _LANE - wt.shape[1]
            wt = jnp.pad(wt, ((0, 0), (0, pad)))
            bvec = jnp.pad(bvec, ((0, pad),))
        weights.append(wt.astype(jnp.bfloat16))
        epi_vecs.append(bvec)

    epi_pack, epi_slices = _pack_epilogues(epi_vecs)

    return {
        "weights": weights,
        "epilogues": epi_pack,
        "epi_slices": epi_slices,
        "n_conv": len(params["convs"]),
        "n_enc": len(params["encoder"]),
        "gcn_taps": tuple(gcn_taps),
        "n_act": n_act,
        "num_actions": num_actions,
    }


# ---------------------------------------------------------------------------
# Pure-JAX f32 reference mirroring the PyTorch module op-for-op (for checking).
# ---------------------------------------------------------------------------

def network_forward_reference(params, states, gso):
    HI = jax.lax.Precision.HIGHEST
    B, A, C, H, W = states.shape
    x = states.reshape(B * A, C, H, W)
    for (w, b, gamma, beta, mean, var) in params["convs"]:
        x = jax.lax.conv_general_dilated(
            x, w, window_strides=(1, 1), padding=((1, 1), (1, 1)),
            dimension_numbers=("NCHW", "OIHW", "NCHW"), precision=HI)
        x = x + b[None, :, None, None]
        x = (x - mean[None, :, None, None]) * (
            gamma[None, :, None, None]
            / jnp.sqrt(var[None, :, None, None] + _BN_EPS)
        ) + beta[None, :, None, None]
        x = jnp.maximum(x, 0.0)
    x = x.reshape(B * A, -1)                               # (C, H, W) order
    for (w, b) in params["encoder"]:
        x = jnp.maximum(jnp.dot(x, w.T, precision=HI) + b, 0.0)
    feat = x.reshape(B, A, -1).transpose(0, 2, 1)          # (B, F, A)
    for (w, b) in params["gcn"]:
        K = w.shape[0]
        z = feat
        acc = jnp.einsum("of,bfa->boa", w[0], z, precision=HI)
        for k in range(1, K):
            z = jnp.einsum("bfa,bac->bfc", z, gso, precision=HI)
            acc = acc + jnp.einsum("of,bfa->boa", w[k], z, precision=HI)
        feat = jnp.maximum(acc + b[None], 0.0)
    y = feat.transpose(0, 2, 1).reshape(B * A, -1)
    n_act = len(params["action"])
    for i, (w, b) in enumerate(params["action"]):
        y = jnp.dot(y, w.T, precision=HI) + b
        if i < n_act - 1:
            y = jnp.maximum(y, 0.0)
    return y.reshape(B, A, -1)


# ---------------------------------------------------------------------------
# Deterministic parameter construction (mirrors the module's __init__ shapes)
# ---------------------------------------------------------------------------

def build_params(key, config):
    channels = [2] + config["channels"]
    compress_dims = config["last_convs"] + config["encoder_dims"]
    features = [compress_dims[-1]] + config["node_dims"]
    action_feats = [features[-1]] + [5]

    def normal(key, shape, scale=0.1):
        return scale * jax.random.normal(key, shape, dtype=jnp.float32)

    params = {"convs": [], "encoder": [], "gcn": [], "action": []}

    for l in range(len(channels) - 1):
        key, k1, k2, k3, k4, k5, k6 = jax.random.split(key, 7)
        cin, cout = channels[l], channels[l + 1]
        params["convs"].append((
            normal(k1, (cout, cin, 3, 3)),                              # conv w
            normal(k2, (cout,)),                                        # conv b
            1.0 + 0.05 * jax.random.normal(k3, (cout,), jnp.float32),   # bn gamma
            normal(k4, (cout,)),                                        # bn beta
            normal(k5, (cout,)),                                        # running mean
            0.5 + jnp.abs(jax.random.normal(k6, (cout,), jnp.float32)), # running var
        ))

    for l in range(config["encoder_layers"]):
        key, k1, k2 = jax.random.split(key, 3)
        params["encoder"].append((
            normal(k1, (compress_dims[l + 1], compress_dims[l])),       # (out, in)
            normal(k2, (compress_dims[l + 1],)),
        ))

    for l, K in enumerate(config["graph_filters"]):
        key, k1, k2 = jax.random.split(key, 3)
        params["gcn"].append((
            normal(k1, (K, features[l + 1], features[l])),              # (K, out, in)
            normal(k2, (features[l + 1], 1)),
        ))

    for l in range(config["action_layers"]):
        key, k1, k2 = jax.random.split(key, 3)
        params["action"].append((
            normal(k1, (action_feats[l + 1], action_feats[l])),         # (out, in)
            normal(k2, (action_feats[l + 1],)),
        ))

    return params


# ---------------------------------------------------------------------------
# Main
# ---------------------------------------------------------------------------

if __name__ == "__main__":
    config = {
        "num_agents": 4,
        "map_shape": [5, 5],
        "channels": [16, 16],            # conv: 2 -> 16 -> 16
        "last_convs": [16 * 5 * 5],      # flattened conv output size
        "encoder_layers": 1,
        "encoder_dims": [64],
        "graph_filters": [2, 3],         # filter taps K per GCN layer
        "node_dims": [64, 32],
        "action_layers": 1,
    }

    key = jax.random.PRNGKey(0)
    key, k_states, k_gso, k_params = jax.random.split(key, 4)

    B, A = 2, config["num_agents"]
    H, W = config["map_shape"]
    states = jax.random.normal(k_states, (B, A, 2, H, W), dtype=jnp.float32)
    # symmetric, zero-diagonal graph shift operator
    g = jax.random.uniform(k_gso, (B, A, A), dtype=jnp.float32)
    gso = (g + jnp.transpose(g, (0, 2, 1))) * 0.5
    gso = gso * (1.0 - jnp.eye(A, dtype=jnp.float32)[None])

    params = build_params(k_params, config)
    prep = prepare_params(params, config)        # one-time weight prep, outside jit

    fwd = jax.jit(functools.partial(network_forward_pallas, prep))
    action_logits = fwd(states, gso)
    jax.block_until_ready(action_logits)

    assert action_logits.shape == (B, A, 5), action_logits.shape
    assert bool(jnp.all(jnp.isfinite(action_logits)))

    # Check against the op-for-op f32 reference (kernel uses bf16 MXU operands,
    # f32 accumulation/epilogues, so allow a small mixed-precision tolerance).
    ref = network_forward_reference(params, states, gso)
    err = float(jnp.max(jnp.abs(action_logits - ref)))
    tol = 0.05 + 0.1 * float(jnp.max(jnp.abs(ref)))
    assert err <= tol, (err, tol)

    print("KERNEL_OK")
</pallas_src>

<mosaic_0001>
module attributes {stable_mosaic.version = 11 : i64} {
  func.func @_network_kernel(%arg0: i32, %arg1: memref<8x50xbf16, #tpu.memory_space<vmem>>, %arg2: memref<1x8x8xf32, #tpu.memory_space<vmem>>, %arg3: memref<1x1536xf32, #tpu.memory_space<vmem>>, %arg4: memref<50x400xbf16, #tpu.memory_space<vmem>>, %arg5: memref<400x400xbf16, #tpu.memory_space<vmem>>, %arg6: memref<400x64xbf16, #tpu.memory_space<vmem>>, %arg7: memref<128x64xbf16, #tpu.memory_space<vmem>>, %arg8: memref<192x32xbf16, #tpu.memory_space<vmem>>, %arg9: memref<32x128xbf16, #tpu.memory_space<vmem>>, %arg10: memref<8x128xf32, #tpu.memory_space<vmem>>) attributes {dimension_semantics = [#tpu.dimension_semantics<parallel>], iteration_bounds = array<i64: 1>, scalar_prefetch = 0 : i64, scratch_operands = 0 : i64, tpu.core_type = #tpu.core_type<tc>, window_params = [{transform_indices = @transform_0, window_bounds = array<i64: 8, 50>}, {transform_indices = @transform_1, window_bounds = array<i64: 1, 8, 8>}, {pipeline_mode = #tpu.pipeline_mode<synchronous>, transform_indices = @transform_2, window_bounds = array<i64: 1, 1536>}, {pipeline_mode = #tpu.pipeline_mode<synchronous>, transform_indices = @transform_3, window_bounds = array<i64: 50, 400>}, {pipeline_mode = #tpu.pipeline_mode<synchronous>, transform_indices = @transform_4, window_bounds = array<i64: 400, 400>}, {pipeline_mode = #tpu.pipeline_mode<synchronous>, transform_indices = @transform_5, window_bounds = array<i64: 400, 64>}, {pipeline_mode = #tpu.pipeline_mode<synchronous>, transform_indices = @transform_6, window_bounds = array<i64: 128, 64>}, {pipeline_mode = #tpu.pipeline_mode<synchronous>, transform_indices = @transform_7, window_bounds = array<i64: 192, 32>}, {pipeline_mode = #tpu.pipeline_mode<synchronous>, transform_indices = @transform_8, window_bounds = array<i64: 32, 128>}, {transform_indices = @transform_9, window_bounds = array<i64: 8, 128>}]} {
    %c0 = arith.constant 0 : index
    %c0_0 = arith.constant 0 : index
    %0 = vector.load %arg1[%c0, %c0_0] : memref<8x50xbf16, #tpu.memory_space<vmem>>, vector<8x50xbf16>
    %c0_1 = arith.constant 0 : index
    %c0_2 = arith.constant 0 : index
    %1 = vector.load %arg4[%c0_1, %c0_2] : memref<50x400xbf16, #tpu.memory_space<vmem>>, vector<50x400xbf16>
    %cst = arith.constant dense<0.000000e+00> : vector<8x400xf32>
    %2 = tpu.matmul %0, %1, %cst {dimension_numbers = #tpu.dot_dimension_numbers<[1], [0], [0], [1], [0, 0, 1, 1], [], []>} : vector<8x50xbf16>, vector<50x400xbf16>, vector<8x400xf32> -> vector<8x400xf32>
    %c0_3 = arith.constant 0 : index
    %c0_4 = arith.constant 0 : index
    %3 = vector.load %arg3[%c0_3, %c0_4] : memref<1x1536xf32, #tpu.memory_space<vmem>>, vector<1x400xf32>
    %4 = vector.broadcast %3 : vector<1x400xf32> to vector<8x400xf32>
    %5 = arith.addf %2, %4 : vector<8x400xf32>
    %cst_5 = arith.constant 0.000000e+00 : f32
    %6 = vector.broadcast %cst_5 : f32 to vector<8x400xf32>
    %7 = arith.maximumf %5, %6 : vector<8x400xf32>
    %8 = arith.truncf %7 : vector<8x400xf32> to vector<8x400xbf16>
    %c0_6 = arith.constant 0 : index
    %c0_7 = arith.constant 0 : index
    %9 = vector.load %arg5[%c0_6, %c0_7] : memref<400x400xbf16, #tpu.memory_space<vmem>>, vector<400x400xbf16>
    %cst_8 = arith.constant dense<0.000000e+00> : vector<8x400xf32>
    %10 = tpu.matmul %8, %9, %cst_8 {dimension_numbers = #tpu.dot_dimension_numbers<[1], [0], [0], [1], [0, 0, 1, 1], [], []>} : vector<8x400xbf16>, vector<400x400xbf16>, vector<8x400xf32> -> vector<8x400xf32>
    %c0_9 = arith.constant 0 : index
    %c512 = arith.constant 512 : index
    %11 = vector.load %arg3[%c0_9, %c512] : memref<1x1536xf32, #tpu.memory_space<vmem>>, vector<1x400xf32>
    %12 = vector.broadcast %11 : vector<1x400xf32> to vector<8x400xf32>
    %13 = arith.addf %10, %12 : vector<8x400xf32>
    %cst_10 = arith.constant 0.000000e+00 : f32
    %14 = vector.broadcast %cst_10 : f32 to vector<8x400xf32>
    %15 = arith.maximumf %13, %14 : vector<8x400xf32>
    %16 = arith.truncf %15 : vector<8x400xf32> to vector<8x400xbf16>
    %c0_11 = arith.constant 0 : index
    %c0_12 = arith.constant 0 : index
    %17 = vector.load %arg6[%c0_11, %c0_12] : memref<400x64xbf16, #tpu.memory_space<vmem>>, vector<400x64xbf16>
    %cst_13 = arith.constant dense<0.000000e+00> : vector<8x64xf32>
    %18 = tpu.matmul %16, %17, %cst_13 {dimension_numbers = #tpu.dot_dimension_numbers<[1], [0], [0], [1], [0, 0, 1, 1], [], []>} : vector<8x400xbf16>, vector<400x64xbf16>, vector<8x64xf32> -> vector<8x64xf32>
    %c0_14 = arith.constant 0 : index
    %c1024 = arith.constant 1024 : index
    %19 = vector.load %arg3[%c0_14, %c1024] : memref<1x1536xf32, #tpu.memory_space<vmem>>, vector<1x64xf32>
    %20 = vector.broadcast %19 : vector<1x64xf32> to vector<8x64xf32>
    %21 = arith.addf %18, %20 : vector<8x64xf32>
    %cst_15 = arith.constant 0.000000e+00 : f32
    %22 = vector.broadcast %cst_15 : f32 to vector<8x64xf32>
    %23 = arith.maximumf %21, %22 : vector<8x64xf32>
    %c0_16 = arith.constant 0 : index
    %c0_17 = arith.constant 0 : index
    %c0_18 = arith.constant 0 : index
    %24 = vector.load %arg2[%c0_16, %c0_17, %c0_18] : memref<1x8x8xf32, #tpu.memory_space<vmem>>, vector<1x8x8xf32>
    %25 = vector.shape_cast %24 : vector<1x8x8xf32> to vector<8x8xf32>
    %cst_19 = arith.constant dense<0.000000e+00> : vector<8x64xf32>
    %26 = tpu.matmul %25, %23, %cst_19 {dimension_numbers = #tpu.dot_dimension_numbers<[1], [0], [0], [1], [0, 0, 1, 1], [], []>} : vector<8x8xf32>, vector<8x64xf32>, vector<8x64xf32> -> vector<8x64xf32>
    %27 = tpu.concatenate %23, %26 in 1 : vector<8x64xf32>, vector<8x64xf32> -> vector<8x128xf32>
    %28 = arith.truncf %27 : vector<8x128xf32> to vector<8x128xbf16>
    %c0_20 = arith.constant 0 : index
    %c0_21 = arith.constant 0 : index
    %29 = vector.load %arg7[%c0_20, %c0_21] : memref<128x64xbf16, #tpu.memory_space<vmem>>, vector<128x64xbf16>
    %cst_22 = arith.constant dense<0.000000e+00> : vector<8x64xf32>
    %30 = tpu.matmul %28, %29, %cst_22 {dimension_numbers = #tpu.dot_dimension_numbers<[1], [0], [0], [1], [0, 0, 1, 1], [], []>} : vector<8x128xbf16>, vector<128x64xbf16>, vector<8x64xf32> -> vector<8x64xf32>
    %c0_23 = arith.constant 0 : index
    %c1152 = arith.constant 1152 : index
    %31 = vector.load %arg3[%c0_23, %c1152] : memref<1x1536xf32, #tpu.memory_space<vmem>>, vector<1x64xf32>
    %32 = vector.broadcast %31 : vector<1x64xf32> to vector<8x64xf32>
    %33 = arith.addf %30, %32 : vector<8x64xf32>
    %cst_24 = arith.constant 0.000000e+00 : f32
    %34 = vector.broadcast %cst_24 : f32 to vector<8x64xf32>
    %35 = arith.maximumf %33, %34 : vector<8x64xf32>
    %cst_25 = arith.constant dense<0.000000e+00> : vector<8x64xf32>
    %36 = tpu.matmul %25, %35, %cst_25 {dimension_numbers = #tpu.dot_dimension_numbers<[1], [0], [0], [1], [0, 0, 1, 1], [], []>} : vector<8x8xf32>, vector<8x64xf32>, vector<8x64xf32> -> vector<8x64xf32>
    %cst_26 = arith.constant dense<0.000000e+00> : vector<8x64xf32>
    %37 = tpu.matmul %25, %36, %cst_26 {dimension_numbers = #tpu.dot_dimension_numbers<[1], [0], [0], [1], [0, 0, 1, 1], [], []>} : vector<8x8xf32>, vector<8x64xf32>, vector<8x64xf32> -> vector<8x64xf32>
    %38 = tpu.concatenate %35, %36, %37 in 1 : vector<8x64xf32>, vector<8x64xf32>, vector<8x64xf32> -> vector<8x192xf32>
    %39 = arith.truncf %38 : vector<8x192xf32> to vector<8x192xbf16>
    %c0_27 = arith.constant 0 : index
    %c0_28 = arith.constant 0 : index
    %40 = vector.load %arg8[%c0_27, %c0_28] : memref<192x32xbf16, #tpu.memory_space<vmem>>, vector<192x32xbf16>
    %cst_29 = arith.constant dense<0.000000e+00> : vector<8x32xf32>
    %41 = tpu.matmul %39, %40, %cst_29 {dimension_numbers = #tpu.dot_dimension_numbers<[1], [0], [0], [1], [0, 0, 1, 1], [], []>} : vector<8x192xbf16>, vector<192x32xbf16>, vector<8x32xf32> -> vector<8x32xf32>
    %c0_30 = arith.constant 0 : index
    %c1280 = arith.constant 1280 : index
    %42 = vector.load %arg3[%c0_30, %c1280] : memref<1x1536xf32, #tpu.memory_space<vmem>>, vector<1x32xf32>
    %43 = vector.broadcast %42 : vector<1x32xf32> to vector<8x32xf32>
    %44 = arith.addf %41, %43 : vector<8x32xf32>
    %cst_31 = arith.constant 0.000000e+00 : f32
    %45 = vector.broadcast %cst_31 : f32 to vector<8x32xf32>
    %46 = arith.maximumf %44, %45 : vector<8x32xf32>
    %47 = arith.truncf %46 : vector<8x32xf32> to vector<8x32xbf16>
    %c0_32 = arith.constant 0 : index
    %c0_33 = arith.constant 0 : index
    %48 = vector.load %arg9[%c0_32, %c0_33] : memref<32x128xbf16, #tpu.memory_space<vmem>>, vector<32x128xbf16>
    %cst_34 = arith.constant dense<0.000000e+00> : vector<8x128xf32>
    %49 = tpu.matmul %47, %48, %cst_34 {dimension_numbers = #tpu.dot_dimension_numbers<[1], [0], [0], [1], [0, 0, 1, 1], [], []>} : vector<8x32xbf16>, vector<32x128xbf16>, vector<8x128xf32> -> vector<8x128xf32>
    %c0_35 = arith.constant 0 : index
    %c1408 = arith.constant 1408 : index
    %50 = vector.load %arg3[%c0_35, %c1408] : memref<1x1536xf32, #tpu.memory_space<vmem>>, vector<1x128xf32>
    %51 = vector.broadcast %50 : vector<1x128xf32> to vector<8x128xf32>
    %52 = arith.addf %49, %51 : vector<8x128xf32>
    %c0_36 = arith.constant 0 : index
    %c0_37 = arith.constant 0 : index
    %53 = vector.load %arg10[%c0_36, %c0_37] : memref<8x128xf32, #tpu.memory_space<vmem>>, vector<8x128xf32>
    tpu.vector_store %arg10[%c0_36, %c0_37], %52 {strides = array<i32>} : memref<8x128xf32, #tpu.memory_space<vmem>>, vector<8x128xf32>,
    return
  }
  func.func @transform_0(%arg0: i32) -> (i32, i32) {
    %c0_i32 = arith.constant 0 : i32
    %c0_i32_0 = arith.constant 0 : i32
    return %arg0, %c0_i32 : i32, i32
  }
  func.func @transform_1(%arg0: i32) -> (i32, i32, i32) {
    %c0_i32 = arith.constant 0 : i32
    %c0_i32_0 = arith.constant 0 : i32
    %c0_i32_1 = arith.constant 0 : i32
    return %arg0, %c0_i32, %c0_i32_0 : i32, i32, i32
  }
  func.func @transform_2(%arg0: i32) -> (i32, i32) {
    %c0_i32 = arith.constant 0 : i32
    %c0_i32_0 = arith.constant 0 : i32
    %c0_i32_1 = arith.constant 0 : i32
    return %c0_i32, %c0_i32_0 : i32, i32
  }
  func.func @transform_3(%arg0: i32) -> (i32, i32) {
    %c0_i32 = arith.constant 0 : i32
    %c0_i32_0 = arith.constant 0 : i32
    %c0_i32_1 = arith.constant 0 : i32
    return %c0_i32, %c0_i32_0 : i32, i32
  }
  func.func @transform_4(%arg0: i32) -> (i32, i32) {
    %c0_i32 = arith.constant 0 : i32
    %c0_i32_0 = arith.constant 0 : i32
    %c0_i32_1 = arith.constant 0 : i32
    return %c0_i32, %c0_i32_0 : i32, i32
  }
  func.func @transform_5(%arg0: i32) -> (i32, i32) {
    %c0_i32 = arith.constant 0 : i32
    %c0_i32_0 = arith.constant 0 : i32
    %c0_i32_1 = arith.constant 0 : i32
    return %c0_i32, %c0_i32_0 : i32, i32
  }
  func.func @transform_6(%arg0: i32) -> (i32, i32) {
    %c0_i32 = arith.constant 0 : i32
    %c0_i32_0 = arith.constant 0 : i32
    %c0_i32_1 = arith.constant 0 : i32
    return %c0_i32, %c0_i32_0 : i32, i32
  }
  func.func @transform_7(%arg0: i32) -> (i32, i32) {
    %c0_i32 = arith.constant 0 : i32
    %c0_i32_0 = arith.constant 0 : i32
    %c0_i32_1 = arith.constant 0 : i32
    return %c0_i32, %c0_i32_0 : i32, i32
  }
  func.func @transform_8(%arg0: i32) -> (i32, i32) {
    %c0_i32 = arith.constant 0 : i32
    %c0_i32_0 = arith.constant 0 : i32
    %c0_i32_1 = arith.constant 0 : i32
    return %c0_i32, %c0_i32_0 : i32, i32
  }
  func.func @transform_9(%arg0: i32) -> (i32, i32) {
    %c0_i32 = arith.constant 0 : i32
    %c0_i32_0 = arith.constant 0 : i32
    return %arg0, %c0_i32 : i32, i32
  }
}

</mosaic_0001>

<bundles_post_ra>
// kernel: network_forward_pallas.1
= control target key start
LH: loop header
LB: loop body
LE: loop exit
PB: predicated region body
PF: predicated region fallthrough
CT: control target
= control target key end

     0   :  { %v2430_v2 = vmov 0   ;;  %vm145_vm0 = vcmask 1040384   ;;  %vm141_vm1 = vcmask 408576   ;;  %s3093_s0 = inlined_call_operand.vmem [shape: bf16[8,50], index: 0, kind: input, shape index: {}]   ;;  %s3094_s1 = inlined_call_operand.vmem [shape: f32[1,8,8], index: 1, kind: input, shape index: {}]   ;;  %s3095_s2 = inlined_call_operand.vmem [shape: f32[1,1536], index: 2, kind: input, shape index: {}]   ;;  %s3096_s3 = inlined_call_operand.vmem [shape: bf16[50,400], index: 3, kind: input, shape index: {}]   ;;  %s3097_s4 = inlined_call_operand.vmem [shape: bf16[400,400], index: 4, kind: input, shape index: {}]   ;;  %s3098_s5 = inlined_call_operand.vmem [shape: bf16[400,64], index: 5, kind: input, shape index: {}]   ;;  %s3099_s6 = inlined_call_operand.vmem [shape: bf16[128,64], index: 6, kind: input, shape index: {}]   ;;  %s3100_s7 = inlined_call_operand.vmem [shape: bf16[192,32], index: 7, kind: input, shape index: {}]   ;;  %s3101_s8 = inlined_call_operand.vmem [shape: bf16[32,128], index: 8, kind: input, shape index: {}]   ;;  %s3102_s9 = inlined_call_operand.hbm [shape: f32[8,128], index: 9, kind: output, shape index: {}]  }
   0x1   :  { %v2187_v0 = vld [vmem:[%s3096_s3 + $0x4] ss:$16 sps:$4 sm:$0xff]   ;;  %v2189_v1 = vld [vmem:[%s3096_s3] ss:$16 sps:$4 sm:$0xff]   ;;  %190 = vmatprep.mubr.bf16.mxu1 %v2430_v2  ;;  %v2200_v11 = vld [vmem:[%s3096_s3 + $0xc] ss:$16 sps:$4 sm:$0xff]  }
   0x2   :  { %158 = vmatprep.subr.bf16.mxu1 %v2187_v0  ;;  %v2190_v3 = vld [vmem:[%s3096_s3 + $0x24] ss:$16 sps:$4 sm:$0xff]   ;;  %v2192_v4 = vld [vmem:[%s3096_s3 + $0x20] ss:$16 sps:$4 sm:$0xff]   ;;  %v2198_v16 = vld [vmem:[%s3096_s3 + $0x8] ss:$16 sps:$4 sm:$0xff]  }
   0x3   :  { %159 = vmatpush1.bf16.msra.mxu1 %v2189_v1  ;;  %v2193_v5 = vld [vmem:[%s3096_s3 + $0x44] ss:$16 sps:$4 sm:$0xff]   ;;  %v2195_v7 = vld [vmem:[%s3096_s3 + $0x40] ss:$16 sps:$4 sm:$0xff]   ;;  %v2203_v19 = vld [vmem:[%s3096_s3 + $0x2c] ss:$16 sps:$4 sm:$0xff]  }
   0x4   :  { %160 = vmatprep.subr.bf16.mxu1 %v2190_v3  ;;  %v47_v6 = vld [vmem:[%s3096_s3 + $0x60] sm:$0x11]  ;;  %v2201_v22 = vld [vmem:[%s3096_s3 + $0x28] ss:$16 sps:$4 sm:$0xff]   ;;  %v2206_v23 = vld [vmem:[%s3096_s3 + $0x4c] ss:$16 sps:$4 sm:$0xff]  }
   0x5   :  { %v1921_v8 = vcombine.high %v47_v6, %v47_v6  ;;  %v1920_v9 = vcombine.low %v47_v6, %v47_v6  ;;  %v2209_v10 = vld [vmem:[%s3097_s4 + $0x4] ss:$16 sps:$4 sm:$0xff]   ;;  %v2214_v12 = vld [vmem:[%s3097_s4] ss:$16 sps:$4 sm:$0xff]   ;;  %v48_v24 = vld [vmem:[%s3096_s3 + $0x68] sm:$0x11] }
   0x6   :  { %874 = vmatprep.subr.bf16.mxu0 %v2209_v10  ;;  %v2215_v14 = vld [vmem:[%s3097_s4 + $0x24] ss:$16 sps:$4 sm:$0xff]   ;;  %v34_v15 = vld [vmem:[%s3093_s0] sm:$0xf]  ;;  %v2204_v27 = vld [vmem:[%s3096_s3 + $0x48] ss:$16 sps:$4 sm:$0xff]   ;;  %v1923_v28 = vcombine.high %v48_v24, %v48_v24  ;;  %v1922_v29 = vcombine.low %v48_v24, %v48_v24 }
   0x7   :  { %161 = vmatpush1.bf16.msra.mxu1 %v2192_v4  ;;  %v147_v13 = vsel %vm145_vm0, %v1920_v9, 0  ;;  %875 = vmatpush1.bf16.msra.mxu0 %v2214_v12  ;;  %v2220_v17 = vld [vmem:[%s3097_s4 + $0x20] ss:$16 sps:$4 sm:$0xff]   ;;  %v2221_v18 = vld [vmem:[%s3097_s4 + $0x44] ss:$16 sps:$4 sm:$0xff]  }
   0x8   :  { %162 = vmatprep.subr.bf16.mxu1 %v2193_v5  ;;  %876 = vmatprep.subr.bf16.mxu0 %v2215_v14  ;;  %v2226_v20 = vld [vmem:[%s3097_s4 + $0x40] ss:$16 sps:$4 sm:$0xff]   ;;  %v2227_v21 = vld [vmem:[%s3097_s4 + $0x64] ss:$16 sps:$4 sm:$0xff]   ;;  %v153_v32 = vsel %vm145_vm0, %v1922_v29, 0 }
   0x9   :  { %v2232_v25 = vld [vmem:[%s3097_s4 + $0x60] ss:$16 sps:$4 sm:$0xff]   ;;  %v2233_v26 = vld [vmem:[%s3097_s4 + $0x84] ss:$16 sps:$4 sm:$0xff]   ;;  %v2213_v33 = vld [vmem:[%s3097_s4 + $0xc] ss:$16 sps:$4 sm:$0xff]  }
   0xa   :  { %v2238_v30 = vld [vmem:[%s3097_s4 + $0x80] ss:$16 sps:$4 sm:$0xff]   ;;  %v2239_v31 = vld [vmem:[%s3097_s4 + $0xa4] ss:$16 sps:$4 sm:$0xff]   ;;  %v2211_v36 = vld [vmem:[%s3097_s4 + $0x8] ss:$16 sps:$4 sm:$0xff]  }
   0xb   :  { %163 = vmatpush1.bf16.msra.mxu1 %v2195_v7  ;;  %877 = vmatpush1.bf16.msra.mxu0 %v2220_v17  ;;  %v2244_v34 = vld [vmem:[%s3097_s4 + $0xa0] ss:$16 sps:$4 sm:$0xff]   ;;  %v2245_v35 = vld [vmem:[%s3097_s4 + $0xc4] ss:$16 sps:$4 sm:$0xff]   ;;  %v2219_v37 = vld [vmem:[%s3097_s4 + $0x2c] ss:$16 sps:$4 sm:$0xff]  }
   0xc   :  { %1924 = vmatprep.subr.msk.bf16.mxu1 %vm145_vm0, %v1921_v8  ;;  %878 = vmatprep.subr.bf16.mxu0 %v2221_v18  ;;  %v2250_v38 = vld [vmem:[%s3097_s4 + $0xc0] ss:$16 sps:$4 sm:$0xff]   ;;  %v2251_v39 = vld [vmem:[%s3097_s4 + $0xe4] ss:$16 sps:$4 sm:$0xff]   ;;  %v2217_v40 = vld [vmem:[%s3097_s4 + $0x28] ss:$16 sps:$4 sm:$0xff]  }
   0xd   :  { %v2225_v41 = vld [vmem:[%s3097_s4 + $0x4c] ss:$16 sps:$4 sm:$0xff]   ;;  %v2256_v42 = vld [vmem:[%s3097_s4 + $0xe0] ss:$16 sps:$4 sm:$0xff]   ;;  %v2257_v43 = vld [vmem:[%s3097_s4 + $0x104] ss:$16 sps:$4 sm:$0xff]  }
   0xe   :  { %v2223_v44 = vld [vmem:[%s3097_s4 + $0x48] ss:$16 sps:$4 sm:$0xff]   ;;  %v2231_v45 = vld [vmem:[%s3097_s4 + $0x6c] ss:$16 sps:$4 sm:$0xff]   ;;  %v2262_v46 = vld [vmem:[%s3097_s4 + $0x100] ss:$16 sps:$4 sm:$0xff]  }
   0xf   :  { %165 = vmatpush1.bf16.msra.mxu1 %v147_v13  ;;  %879 = vmatpush1.bf16.msra.mxu0 %v2226_v20  ;;  %v2263_v47 = vld [vmem:[%s3097_s4 + $0x124] ss:$16 sps:$4 sm:$0xff]   ;;  %v2229_v48 = vld [vmem:[%s3097_s4 + $0x68] ss:$16 sps:$4 sm:$0xff]   ;;  %v2237_v49 = vld [vmem:[%s3097_s4 + $0x8c] ss:$16 sps:$4 sm:$0xff]  }
  0x10   :  { %199 = vmatprep.subr.bf16.mxu1 %v2200_v11  ;;  %880 = vmatprep.subr.bf16.mxu0 %v2227_v21  ;;  %v2235_v50 = vld [vmem:[%s3097_s4 + $0x88] ss:$16 sps:$4 sm:$0xff]   ;;  %v2268_v51 = vld [vmem:[%s3097_s4 + $0x120] ss:$16 sps:$4 sm:$0xff]   ;;  %v2243_v52 = vld [vmem:[%s3097_s4 + $0xac] ss:$16 sps:$4 sm:$0xff]  }
  0x11   :  { %v2269_v53 = vld [vmem:[%s3097_s4 + $0x144] ss:$16 sps:$4 sm:$0xff]   ;;  %v2274_v54 = vld [vmem:[%s3097_s4 + $0x140] ss:$16 sps:$4 sm:$0xff]   ;;  %v2241_v56 = vld [vmem:[%s3097_s4 + $0xa8] ss:$16 sps:$4 sm:$0xff]  }
  0x12   :  { %1925 = vmatmul.mubr.msk.bf16.vlgmr.msra.gmra.mrb[0].mxu1 %vm141_vm1, %v34_v15  ;;  %v2275_v55 = vld [vmem:[%s3097_s4 + $0x164] ss:$16 sps:$4 sm:$0xff]   ;;  %v2249_v57 = vld [vmem:[%s3097_s4 + $0xcc] ss:$16 sps:$4 sm:$0xff]   ;;  %v2280_v58 = vld [vmem:[%s3097_s4 + $0x160] ss:$16 sps:$4 sm:$0xff]  }
  0x13   :  { %200 = vmatpush1.bf16.msra.mxu1 %v2198_v16  ;;  %231 = vmatprep.mubr.bf16.mxu1 %v2430_v2  ;;  %v2281_v59 = vld [vmem:[%s3097_s4 + $0x184] ss:$16 sps:$4 sm:$0xff]   ;;  %v2247_v60 = vld [vmem:[%s3097_s4 + $0xc8] ss:$16 sps:$4 sm:$0xff]   ;;  %v2255_v61 = vld [vmem:[%s3097_s4 + $0xec] ss:$16 sps:$4 sm:$0xff]  }
  0x14   :  { %201 = vmatprep.subr.bf16.mxu1 %v2203_v19  ;;  %881 = vmatpush1.bf16.msra.mxu0 %v2232_v25  ;;  %v2286_v62 = vld [vmem:[%s3097_s4 + $0x180] ss:$16 sps:$4 sm:$0xff]   ;;  %v2287_v63 = vld [vmem:[%s3097_s4 + $0x1a4] ss:$16 sps:$4 sm:$0xff]   ;;  %v2253_v0 = vld [vmem:[%s3097_s4 + $0xe8] ss:$16 sps:$4 sm:$0xff]  }
  0x15   :  { %882 = vmatprep.subr.bf16.mxu0 %v2233_v26  ;;  %v2261_v1 = vld [vmem:[%s3097_s4 + $0x10c] ss:$16 sps:$4 sm:$0xff]   ;;  %v2292_v3 = vld [vmem:[%s3097_s4 + $0x1a0] ss:$16 sps:$4 sm:$0xff]   ;;  %v2259_v4 = vld [vmem:[%s3097_s4 + $0x108] ss:$16 sps:$4 sm:$0xff]  }
  0x16   :  { %v2267_v5 = vld [vmem:[%s3097_s4 + $0x12c] ss:$16 sps:$4 sm:$0xff]   ;;  %v2265_v6 = vld [vmem:[%s3097_s4 + $0x128] ss:$16 sps:$4 sm:$0xff]  }
  0x17   :  { %202 = vmatpush1.bf16.msra.mxu1 %v2201_v22  ;;  %v2273_v7 = vld [vmem:[%s3097_s4 + $0x14c] ss:$16 sps:$4 sm:$0xff]   ;;  %v2271_v8 = vld [vmem:[%s3097_s4 + $0x148] ss:$16 sps:$4 sm:$0xff]  }
  0x18   :  { %203 = vmatprep.subr.bf16.mxu1 %v2206_v23  ;;  %883 = vmatpush1.bf16.msra.mxu0 %v2238_v30  ;;  %v2279_v9 = vld [vmem:[%s3097_s4 + $0x16c] ss:$16 sps:$4 sm:$0xff]   ;;  %v2277_v10 = vld [vmem:[%s3097_s4 + $0x168] ss:$16 sps:$4 sm:$0xff]  }
  0x19   :  { %884 = vmatprep.subr.bf16.mxu0 %v2239_v31  ;;  %v2285_v11 = vld [vmem:[%s3097_s4 + $0x18c] ss:$16 sps:$4 sm:$0xff]   ;;  %v2283_v12 = vld [vmem:[%s3097_s4 + $0x188] ss:$16 sps:$4 sm:$0xff]  }
  0x1a   :  { %v2291_v13 = vld [vmem:[%s3097_s4 + $0x1ac] ss:$16 sps:$4 sm:$0xff]   ;;  %v2289_v14 = vld [vmem:[%s3097_s4 + $0x1a8] ss:$16 sps:$4 sm:$0xff]  }
  0x1b   :  { %204 = vmatpush1.bf16.msra.mxu1 %v2204_v27 }
  0x1c   :  { %1926 = vmatprep.subr.msk.bf16.mxu1 %vm145_vm0, %v1923_v28  ;;  %885 = vmatpush1.bf16.msra.mxu0 %v2244_v34 }
  0x1d   :  { %886 = vmatprep.subr.bf16.mxu0 %v2245_v35 }
  0x1f   :  { %206 = vmatpush1.bf16.msra.mxu1 %v153_v32 }
  0x20   :  { %956 = vmatprep.subr.bf16.mxu1 %v2213_v33  ;;  %887 = vmatpush1.bf16.msra.mxu0 %v2250_v38 }
  0x21   :  { %888 = vmatprep.subr.bf16.mxu0 %v2251_v39 }
  0x22   :  { %1927 = vmatmul.mubr.msk.bf16.vlgmr.msra.gmra.mrb[4].mxu1 %vm141_vm1, %v34_v15 }
  0x23   :  { %957 = vmatpush1.bf16.msra.mxu1 %v2211_v36 }
  0x24   :  { %958 = vmatprep.subr.bf16.mxu1 %v2219_v37  ;;  %889 = vmatpush1.bf16.msra.mxu0 %v2256_v42 }
  0x25   :  { %890 = vmatprep.subr.bf16.mxu0 %v2257_v43 }
  0x27   :  { %959 = vmatpush1.bf16.msra.mxu1 %v2217_v40 }
  0x28   :  { %960 = vmatprep.subr.bf16.mxu1 %v2225_v41  ;;  %891 = vmatpush1.bf16.msra.mxu0 %v2262_v46 }
  0x29   :  { %892 = vmatprep.subr.bf16.mxu0 %v2263_v47 }
  0x2b   :  { %961 = vmatpush1.bf16.msra.mxu1 %v2223_v44 }
  0x2c   :  { %962 = vmatprep.subr.bf16.mxu1 %v2231_v45  ;;  %893 = vmatpush1.bf16.msra.mxu0 %v2268_v51 }
  0x2d   :  { %894 = vmatprep.subr.bf16.mxu0 %v2269_v53 }
  0x2f   :  { %963 = vmatpush1.bf16.msra.mxu1 %v2229_v48 }
  0x30   :  { %964 = vmatprep.subr.bf16.mxu1 %v2237_v49  ;;  %895 = vmatpush1.bf16.msra.mxu0 %v2274_v54 }
  0x31   :  { %896 = vmatprep.subr.bf16.mxu0 %v2275_v55 }
  0x33   :  { %965 = vmatpush1.bf16.msra.mxu1 %v2235_v50 }
  0x34   :  { %966 = vmatprep.subr.bf16.mxu1 %v2243_v52  ;;  %897 = vmatpush1.bf16.msra.mxu0 %v2280_v58 }
  0x35   :  { %898 = vmatprep.subr.bf16.mxu0 %v2281_v59 }
  0x37   :  { %967 = vmatpush1.bf16.msra.mxu1 %v2241_v56 }
  0x38   :  { %968 = vmatprep.subr.bf16.mxu1 %v2249_v57  ;;  %899 = vmatpush1.bf16.msra.mxu0 %v2286_v62 }
  0x39   :  { %900 = vmatprep.subr.bf16.mxu0 %v2287_v63 }
  0x3b   :  { %969 = vmatpush1.bf16.msra.mxu1 %v2247_v60 }
  0x3c   :  { %970 = vmatprep.subr.bf16.mxu1 %v2255_v61  ;;  %901 = vmatpush1.bf16.msra.mxu0 %v2292_v3 }
  0x3f   :  { %971 = vmatpush1.bf16.msra.mxu1 %v2253_v0 }
  0x40   :  { %972 = vmatprep.subr.bf16.mxu1 %v2261_v1 }
  0x43   :  { %973 = vmatpush1.bf16.msra.mxu1 %v2259_v4 }
  0x44   :  { %974 = vmatprep.subr.bf16.mxu1 %v2267_v5 }
  0x47   :  { %975 = vmatpush1.bf16.msra.mxu1 %v2265_v6 }
  0x48   :  { %976 = vmatprep.subr.bf16.mxu1 %v2273_v7 }
  0x4b   :  { %977 = vmatpush1.bf16.msra.mxu1 %v2271_v8 }
  0x4c   :  { %978 = vmatprep.subr.bf16.mxu1 %v2279_v9 }
  0x4f   :  { %979 = vmatpush1.bf16.msra.mxu1 %v2277_v10 }
  0x50   :  { %980 = vmatprep.subr.bf16.mxu1 %v2285_v11 }
  0x53   :  { %981 = vmatpush1.bf16.msra.mxu1 %v2283_v12 }
  0x54   :  { %982 = vmatprep.subr.bf16.mxu1 %v2291_v13 }
  0x57   :  { %983 = vmatpush1.bf16.msra.mxu1 %v2289_v14 }
  0x58   :  { %14 = vsyncpa [#allocation3], 0  ;;  %v2293_v15 = vld [vmem:[%s3097_s4 + $0x1c4] ss:$16 sps:$4 sm:$0xff]   ;;  %v2297_v16 = vld [vmem:[%s3097_s4 + $0x1cc] ss:$16 sps:$4 sm:$0xff]   ;;  %v51_v25 = vlaneseq }
  0x59   :  { %v2295_v17 = vld [vmem:[%s3097_s4 + $0x1c8] ss:$16 sps:$4 sm:$0xff]   ;;  %v2298_v18 = vld [vmem:[%s3097_s4 + $0x1c0] ss:$16 sps:$4 sm:$0xff]   ;;  %902 = vmatprep.subr.bf16.mxu0 %v2293_v15  ;;  %984 = vmatprep.subr.bf16.mxu1 %v2297_v16  ;;  %v2299_v19 = vld [vmem:[%s3097_s4 + $0x1e4] ss:$16 sps:$4 sm:$0xff]  }
  0x5a   :  { %903 = vmatpush1.bf16.msra.mxu0 %v2298_v18  ;;  %v2303_v20 = vld [vmem:[%s3097_s4 + $0x1ec] ss:$16 sps:$4 sm:$0xff]   ;;  %v2301_v21 = vld [vmem:[%s3097_s4 + $0x1e8] ss:$16 sps:$4 sm:$0xff]   ;;  %v2304_v22 = vld [vmem:[%s3097_s4 + $0x1e0] ss:$16 sps:$4 sm:$0xff]  }
  0x5b   :  { %985 = vmatpush1.bf16.msra.mxu1 %v2295_v17  ;;  %904 = vmatprep.subr.bf16.mxu0 %v2299_v19  ;;  %v2307_v23 = vld [vmem:[%s3097_s4 + $0x204] ss:$16 sps:$4 sm:$0xff]   ;;  %v2310_v24 = vld [vmem:[%s3097_s4 + $0x20c] ss:$16 sps:$4 sm:$0xff]   ;;  %v2736_v26 = vshrl.u32 %v51_v25, 7  ;;  %vm870_vm2 = vcmask 130048  }
  0x5c   :  { %986 = vmatprep.subr.bf16.mxu1 %v2303_v20  ;;  %v2742_v28 = vld [vmem:[%s3095_s2] sm:$0xf]  ;;  %v2308_v42 = vld [vmem:[%s3097_s4 + $0x208] ss:$16 sps:$4 sm:$0xff]   ;;  %v2313_v44 = vld [vmem:[%s3097_s4 + $0x224] ss:$16 sps:$4 sm:$0xff]  }
  0x5d   :  { %v53_v27 = vsub.s32 0, %v2736_v26  ;;  %v57_v29 = vsub.s32 1, %v2736_v26  ;;  %v2305_v41 = vld [vmem:[%s3097_s4 + $0x200] ss:$16 sps:$4 sm:$0xff]   ;;  %v2316_v45 = vld [vmem:[%s3097_s4 + $0x22c] ss:$16 sps:$4 sm:$0xff]  }
  0x5e   :  { %905 = vmatpush1.bf16.msra.mxu0 %v2304_v22  ;;  %v2311_v46 = vld [vmem:[%s3097_s4 + $0x220] ss:$16 sps:$4 sm:$0xff]   ;;  %v2314_v47 = vld [vmem:[%s3097_s4 + $0x228] ss:$16 sps:$4 sm:$0xff]   ;;  %v65_v48 = vsub.s32 3, %v2736_v26  ;;  %v61_v10 = vsub.s32 2, %v2736_v26 }
  0x5f   :  { %987 = vmatpush1.bf16.msra.mxu1 %v2301_v21  ;;  %915 = vmatprep.subr.bf16.mxu0 %v2307_v23  ;;  %v54_v30 = vrot.slane %v2742_v28, %v53_v27  ;;  %v58_v31 = vrot.slane %v2742_v28, %v57_v29  ;;  %v2319_v49 = vld [vmem:[%s3097_s4 + $0x244] ss:$16 sps:$4 sm:$0xff]   ;;  %v2322_v50 = vld [vmem:[%s3097_s4 + $0x24c] ss:$16 sps:$4 sm:$0xff]   ;;  %v2317_v51 = vld [vmem:[%s3097_s4 + $0x240] ss:$16 sps:$4 sm:$0xff]  }
  0x60   :  { %997 = vmatprep.subr.bf16.mxu1 %v2310_v24  ;;  %v2320_v52 = vld [vmem:[%s3097_s4 + $0x248] ss:$16 sps:$4 sm:$0xff]   ;;  %v66_v53 = vrot.slane %v2742_v28, %v65_v48  ;;  %v2325_v54 = vld [vmem:[%s3097_s4 + $0x264] ss:$16 sps:$4 sm:$0xff]   ;;  %v2328_v55 = vld [vmem:[%s3097_s4 + $0x26c] ss:$16 sps:$4 sm:$0xff]   ;;  %v62_v15 = vrot.slane %v2742_v28, %v61_v10 }
  0x61   :  { %v2323_v58 = vld [vmem:[%s3097_s4 + $0x260] ss:$16 sps:$4 sm:$0xff]   ;;  %v2326_v59 = vld [vmem:[%s3097_s4 + $0x268] ss:$16 sps:$4 sm:$0xff]   ;;  %v2331_v62 = vld [vmem:[%s3097_s4 + $0x284] ss:$16 sps:$4 sm:$0xff]  }
  0x62   :  { %v2334_v63 = vld [vmem:[%s3097_s4 + $0x28c] ss:$16 sps:$4 sm:$0xff]   ;;  %v2329_v3 = vld [vmem:[%s3097_s4 + $0x280] ss:$16 sps:$4 sm:$0xff]   ;;  %v2332_v4 = vld [vmem:[%s3097_s4 + $0x288] ss:$16 sps:$4 sm:$0xff]  }
  0x63   :  { %v2337_v6 = vld [vmem:[%s3097_s4 + $0x2a4] ss:$16 sps:$4 sm:$0xff]   ;;  %v2340_v7 = vld [vmem:[%s3097_s4 + $0x2ac] ss:$16 sps:$4 sm:$0xff]   ;;  %v2335_v8 = vld [vmem:[%s3097_s4 + $0x2a0] ss:$16 sps:$4 sm:$0xff]  }
  0x64   :  { %v2338_v9 = vld [vmem:[%s3097_s4 + $0x2a8] ss:$16 sps:$4 sm:$0xff]   ;;  %v2343_v11 = vld [vmem:[%s3097_s4 + $0x2c4] ss:$16 sps:$4 sm:$0xff]   ;;  %v2346_v12 = vld [vmem:[%s3097_s4 + $0x2cc] ss:$16 sps:$4 sm:$0xff]  }
  0x65   :  { %v2341_v13 = vld [vmem:[%s3097_s4 + $0x2c0] ss:$16 sps:$4 sm:$0xff]   ;;  %v2344_v14 = vld [vmem:[%s3097_s4 + $0x2c8] ss:$16 sps:$4 sm:$0xff]   ;;  %v2349_v16 = vld [vmem:[%s3097_s4 + $0x2e4] ss:$16 sps:$4 sm:$0xff]  }
  0x66   :  { %v2352_v17 = vld [vmem:[%s3097_s4 + $0x2ec] ss:$16 sps:$4 sm:$0xff]   ;;  %v2347_v18 = vld [vmem:[%s3097_s4 + $0x2e0] ss:$16 sps:$4 sm:$0xff]   ;;  %v2350_v19 = vld [vmem:[%s3097_s4 + $0x2e8] ss:$16 sps:$4 sm:$0xff]  }
  0x67   :  { %v2355_v21 = vld [vmem:[%s3097_s4 + $0x304] ss:$16 sps:$4 sm:$0xff]   ;;  %v2358_v22 = vld [vmem:[%s3097_s4 + $0x30c] ss:$16 sps:$4 sm:$0xff]   ;;  %v2353_v23 = vld [vmem:[%s3097_s4 + $0x300] ss:$16 sps:$4 sm:$0xff]  }
  0x68   :  { %v2356_v24 = vld [vmem:[%s3097_s4 + $0x308] ss:$16 sps:$4 sm:$0xff]   ;;  %v2360_v28 = vld [vmem:[%s3098_s5 + $0x40] sm:$0xff]   ;;  %vm2432_vm3 = vmmov 0   ;;  %vm1338_vm4 = vcmask 64512   ;;  %s2433_s12 = smov 64  }
  0x69   :  { %vm1416_vm5 = vcmask 523264   ;;  %vm1849_vm6 = vcmask 261120  }
  0xe5   :  { %v192_v32 = vpop.f32.mrb[0].mxu1 }
  0xe6   :  { %v193_v33 = vadd.f32 %v192_v32, %v54_v30  ;;  %v194_v34 = vpop.f32.mrb[1].mxu1  ;;  %v2359_v30 = vld [vmem:[%s3098_s5 + $0x80] sm:$0xff]  }
  0xe7   :  { %v195_v35 = vadd.f32 %v194_v34, %v58_v31  ;;  %v196_v36 = vpop.f32.mrb[2].mxu1  ;;  %v2361_v31 = vld [vmem:[%s3098_s5] sm:$0xff]   ;;  %v2362_v34 = vld [vmem:[%s3098_s5 + $0x88] sm:$0xff]  }
  0xe8   :  { %v240_v37 = vmax.f32 %v193_v33, 0.0  ;;  %v197_v38 = vpop.f32.mrb[3].mxu1  ;;  %v2363_v33 = vld [vmem:[%s3098_s5 + $0x48] sm:$0xff]   ;;  %v2366_v36 = vld [vmem:[%s3098_s5 + $0x50] sm:$0xff]  }
  0xe9   :  { %v241_v39 = vmax.f32 %v195_v35, 0.0  ;;  %v2364_v35 = vld [vmem:[%s3098_s5 + $0x8] sm:$0xff]   ;;  %v2367_v38 = vld [vmem:[%s3098_s5 + $0x10] sm:$0xff]  }
  0xea   :  { %v244_v43 = vpack.c.bf16 %v240_v37, %v240_v37  ;;  %v2365_v37 = vld [vmem:[%s3098_s5 + $0x90] sm:$0xff]  }
  0xeb   :  { %v245_v40 = vpack.c.bf16 %v241_v39, %v241_v39  ;;  %v2369_v39 = vld [vmem:[%s3098_s5 + $0x58] sm:$0xff]  }
  0xed   :  { %906 = vmatprep.mubr.bf16.mxu0 %v245_v40  ;;  %988 = vmatprep.mubr.bf16.mxu1 %v245_v40  ;;  %v2368_v40 = vld [vmem:[%s3098_s5 + $0x98] sm:$0xff]  }
  0xee   :  { %907 = vmatmul.mubr.bf16.vlgmr.msra.gmra.mrb[0].mxu0 %v244_v43  ;;  %989 = vmatmul.mubr.bf16.vlgmr.msra.gmra.mrb[8].mxu1 %v244_v43  ;;  %v2371_v43 = vld [vmem:[%s3098_s5 + $0xa0] sm:$0xff]  }
  0xef   :  { %916 = vmatpush1.bf16.msra.mxu0 %v2305_v41  ;;  %998 = vmatpush1.bf16.msra.mxu1 %v2308_v42  ;;  %v2370_v41 = vld [vmem:[%s3098_s5 + $0x18] sm:$0xff]   ;;  %v2372_v42 = vld [vmem:[%s3098_s5 + $0x60] sm:$0xff]  }
  0xf0   :  { %917 = vmatprep.subr.bf16.mxu0 %v2313_v44  ;;  %999 = vmatprep.subr.bf16.mxu1 %v2316_v45  ;;  %v2373_v44 = vld [vmem:[%s3098_s5 + $0x20] sm:$0xff]   ;;  %v2375_v45 = vld [vmem:[%s3098_s5 + $0x68] sm:$0xff]  }
  0xf3   :  { %918 = vmatpush1.bf16.msra.mxu0 %v2311_v46  ;;  %1000 = vmatpush1.bf16.msra.mxu1 %v2314_v47  ;;  %v2374_v46 = vld [vmem:[%s3098_s5 + $0xa8] sm:$0xff]  }
  0xf4   :  { %919 = vmatprep.subr.bf16.mxu0 %v2319_v49  ;;  %1001 = vmatprep.subr.bf16.mxu1 %v2322_v50  ;;  %v2376_v47 = vld [vmem:[%s3098_s5 + $0x28] sm:$0xff]   ;;  %v2377_v49 = vld [vmem:[%s3098_s5 + $0xb0] sm:$0xff]  }
  0xf5   :  { %v233_v56 = vpop.f32.mrb[4].mxu1  ;;  %v2378_v50 = vld [vmem:[%s3098_s5 + $0x70] sm:$0xff]  }
  0xf6   :  { %v235_v57 = vpop.f32.mrb[5].mxu1  ;;  %v234_v20 = vadd.f32 %v233_v56, %v62_v15  ;;  %v348_v56 = vld [vmem:[%s3095_s2 + $0x4] sm:$0xf] }
  0xf7   :  { %920 = vmatpush1.bf16.msra.mxu0 %v2317_v51  ;;  %1002 = vmatpush1.bf16.msra.mxu1 %v2320_v52  ;;  %v236_v60 = vadd.f32 %v235_v57, %v66_v53  ;;  %v237_v61 = vpop.f32.mrb[6].mxu1  ;;  %v2379_v51 = vld [vmem:[%s3098_s5 + $0x30] sm:$0xff]   ;;  %v2380_v52 = vld [vmem:[%s3098_s5 + $0xb8] sm:$0xff]   ;;  %v353_v57 = vrot.slane %v348_v56, %v53_v27 }
  0xf8   :  { %921 = vmatprep.subr.bf16.mxu0 %v2325_v54  ;;  %1003 = vmatprep.subr.bf16.mxu1 %v2328_v55  ;;  %v238_v0 = vpop.f32.mrb[7].mxu1  ;;  %v242_v25 = vmax.f32 %v234_v20, 0.0  ;;  %v2381_v53 = vld [vmem:[%s3098_s5 + $0x78] sm:$0xff]   ;;  %v2383_v55 = vld [vmem:[%s3098_s5 + $0xc0] sm:$0xff]  }
  0xf9   :  { %v243_v1 = vmax.f32 %v236_v60, 0.0  ;;  %v2382_v54 = vld [vmem:[%s3098_s5 + $0x38] sm:$0xff]   ;;  %v365_v60 = vrot.slane %v348_v56, %v65_v48  ;;  %s2434_s5 = smov [#allocation2]  }
  0xfa   :  { %v246_v32 = vpack.c.bf16 %v242_v25, %v242_v25 }
  0xfb   :  { %922 = vmatpush1.bf16.msra.mxu0 %v2323_v58  ;;  %1004 = vmatpush1.bf16.msra.mxu1 %v2326_v59  ;;  %v247_v5 = vpack.c.bf16 %v243_v1, %v243_v1  ;;  %v361_v58 = vrot.slane %v348_v56, %v61_v10  ;;  %v357_v59 = vrot.slane %v348_v56, %v57_v29  ;;  %v2393_v56 = vld [vmem:[%s3100_s7 + $0x8] sm:$0xff]  }
  0xfc   :  { %923 = vmatprep.subr.bf16.mxu0 %v2331_v62  ;;  %1005 = vmatprep.subr.bf16.mxu1 %v2334_v63 }
  0xfd   :  { %2028 = vmatprep.mubr.msk.bf16.mxu0 %vm870_vm2, %v247_v5  ;;  %2029 = vmatprep.mubr.msk.bf16.mxu1 %vm870_vm2, %v247_v5 }
  0xff   :  { %924 = vmatpush1.bf16.msra.mxu0 %v2329_v3  ;;  %1006 = vmatpush1.bf16.msra.mxu1 %v2332_v4 }
 0x100   :  { %925 = vmatprep.subr.bf16.mxu0 %v2337_v6  ;;  %1007 = vmatprep.subr.bf16.mxu1 %v2340_v7 }
 0x103   :  { %926 = vmatpush1.bf16.msra.mxu0 %v2335_v8  ;;  %1008 = vmatpush1.bf16.msra.mxu1 %v2338_v9 }
 0x104   :  { %927 = vmatprep.subr.bf16.mxu0 %v2343_v11  ;;  %1009 = vmatprep.subr.bf16.mxu1 %v2346_v12 }
 0x107   :  { %928 = vmatpush1.bf16.msra.mxu0 %v2341_v13  ;;  %1010 = vmatpush1.bf16.msra.mxu1 %v2344_v14  ;;  %v2431_v14 = vmov 0.0  }
 0x108   :  { %929 = vmatprep.subr.bf16.mxu0 %v2349_v16  ;;  %1011 = vmatprep.subr.bf16.mxu1 %v2352_v17  ;;  %v2030_v17 = vld [vmem:[%s3095_s2 + $0x8] ss:$0 sm:$0xff] }
 0x10b   :  { %930 = vmatpush1.bf16.msra.mxu0 %v2347_v18  ;;  %1012 = vmatpush1.bf16.msra.mxu1 %v2350_v19 }
 0x10c   :  { %931 = vmatprep.subr.bf16.mxu0 %v2355_v21  ;;  %1013 = vmatprep.subr.bf16.mxu1 %v2358_v22 }
 0x10f   :  { %932 = vmatpush1.bf16.msra.mxu0 %v2353_v23  ;;  %1014 = vmatpush1.bf16.msra.mxu1 %v2356_v24 }
 0x110   :  { %1296 = vmatprep.subr.bf16.mxu1 %v2430_v2  ;;  %2087 = vmatprep.subr.bf16.mxu0 %v2360_v28 }
 0x112   :  { %948 = vmatmul.mubr.bf16.vlgmr.msra.gmra.mrb[0].mxu0 %v246_v32  ;;  %1030 = vmatmul.mubr.bf16.vlgmr.msra.gmra.mrb[8].mxu1 %v246_v32  ;;  %v2384_v32 = vld [vmem:[%s3099_s6] sm:$0xff]  }
 0x113   :  { %1297 = vmatpush1.bf16.msra.mxu1 %v2359_v30  ;;  %2088 = vmatpush3.bf16.msra.mxu0 %v2361_v31  ;;  %v1337_v31 = vld [vmem:[%s3094_s1] sm:$0xff] }
 0x114   :  { %1298 = vmatprep.subr.bf16.mxu1 %v2430_v2  ;;  %2089 = vmatprep.subr.bf16.mxu0 %v2363_v33  ;;  %v2385_v33 = vld [vmem:[%s3099_s6 + $0x8] sm:$0xff]  }
 0x117   :  { %1299 = vmatpush1.bf16.msra.mxu1 %v2362_v34  ;;  %2090 = vmatpush3.bf16.msra.mxu0 %v2364_v35  ;;  %v2386_v34 = vld [vmem:[%s3099_s6 + $0x10] sm:$0xff]   ;;  %v2387_v35 = vld [vmem:[%s3099_s6 + $0x18] sm:$0xff]  }
 0x118   :  { %1300 = vmatprep.subr.bf16.mxu1 %v2430_v2  ;;  %2091 = vmatprep.subr.bf16.mxu0 %v2366_v36  ;;  %v2388_v36 = vld [vmem:[%s3099_s6 + $0x20] sm:$0xff]  }
 0x11b   :  { %1301 = vmatpush1.bf16.msra.mxu1 %v2365_v37  ;;  %2092 = vmatpush3.bf16.msra.mxu0 %v2367_v38  ;;  %v2389_v37 = vld [vmem:[%s3099_s6 + $0x28] sm:$0xff]   ;;  %v2390_v38 = vld [vmem:[%s3099_s6 + $0x30] sm:$0xff]  }
 0x11c   :  { %1302 = vmatprep.subr.bf16.mxu1 %v2430_v2  ;;  %2093 = vmatprep.subr.bf16.mxu0 %v2369_v39  ;;  %v2391_v39 = vld [vmem:[%s3099_s6 + $0x38] sm:$0xff]  }
 0x11f   :  { %1303 = vmatpush1.bf16.msra.mxu1 %v2368_v40  ;;  %2094 = vmatpush3.bf16.msra.mxu0 %v2370_v41 }
 0x120   :  { %1304 = vmatprep.subr.bf16.mxu1 %v2430_v2  ;;  %2095 = vmatprep.subr.bf16.mxu0 %v2372_v42 }
 0x123   :  { %1305 = vmatpush1.bf16.msra.mxu1 %v2371_v43  ;;  %2096 = vmatpush3.bf16.msra.mxu0 %v2373_v44 }
 0x124   :  { %1306 = vmatprep.subr.bf16.mxu1 %v2430_v2  ;;  %2097 = vmatprep.subr.bf16.mxu0 %v2375_v45  ;;  %v2058_v45 = vld [vmem:[%s3095_s2 + $0x9] ss:$0 sm:$0xff] }
 0x127   :  { %1307 = vmatpush1.bf16.msra.mxu1 %v2374_v46  ;;  %2098 = vmatpush3.bf16.msra.mxu0 %v2376_v47 }
 0x128   :  { %1308 = vmatprep.subr.bf16.mxu1 %v2430_v2  ;;  %2099 = vmatprep.subr.bf16.mxu0 %v2378_v50 }
 0x12b   :  { %1309 = vmatpush1.bf16.msra.mxu1 %v2377_v49  ;;  %2100 = vmatpush3.bf16.msra.mxu0 %v2379_v51 }
 0x12c   :  { %1310 = vmatprep.subr.bf16.mxu1 %v2430_v2  ;;  %2101 = vmatprep.subr.bf16.mxu0 %v2381_v53  ;;  %v2392_v53 = vld [vmem:[%s3100_s7] sm:$0xff]  }
 0x12f   :  { %1311 = vmatpush1.bf16.msra.mxu1 %v2380_v52  ;;  %2102 = vmatpush3.bf16.msra.mxu0 %v2382_v54 }
 0x130   :  { %1312 = vmatprep.subr.bf16.mxu1 %v2430_v2  ;;  %2127 = vmatprep.subr.mxu0 %v2431_v14 }
 0x133   :  { %1313 = vmatpush1.bf16.msra.mxu1 %v2383_v55 }
 0x134   :  { %2132 = vmatprep.subr.bf16.mxu1 %v2431_v14 }
 0x1e5   :  { %v949_v61 = vpop.f32.mrb[0].mxu0  ;;  %v1031_v62 = vpop.f32.mrb[8].mxu1 }
 0x1e6   :  { %v2170_v63 = vadd.f32 %v949_v61, %v353_v57  ;;  %v2172_v0 = vadd.f32 %v1031_v62, %v361_v58  ;;  %v951_v1 = vpop.f32.mrb[1].mxu0  ;;  %v1033_v3 = vpop.f32.mrb[9].mxu1  ;;  %v2394_v57 = vld [vmem:[%s3100_s7 + $0x10] sm:$0xff]   ;;  %v2395_v58 = vld [vmem:[%s3100_s7 + $0x18] sm:$0xff]  }
 0x1e7   :  { %v2171_v4 = vadd.f32 %v951_v1, %v357_v59  ;;  %v2173_v5 = vadd.f32 %v1033_v3, %v365_v60  ;;  %v953_v6 = vpop.f32.mrb[2].mxu0  ;;  %v1035_v7 = vpop.f32.mrb[10].mxu1  ;;  %v2396_v59 = vld [vmem:[%s3100_s7 + $0x20] sm:$0xff]   ;;  %v2397_v60 = vld [vmem:[%s3100_s7 + $0x28] sm:$0xff]   ;;  %v2398_v61 = vld [vmem:[%s3100_s7 + $0x30] sm:$0xff]  }
 0x1e8   :  { %v1038_v27 = vmax.f32 %v2170_v63, 0.0  ;;  %v1040_v8 = vmax.f32 %v2172_v0, 0.0  ;;  %v954_v9 = vpop.f32.mrb[3].mxu0  ;;  %v1036_v10 = vpop.f32.mrb[11].mxu1  ;;  %v2399_v62 = vld [vmem:[%s3100_s7 + $0x38] sm:$0xff]   ;;  %v2400_v63 = vld [vmem:[%s3100_s7 + $0x40] sm:$0xff]  }
 0x1e9   :  { %v1039_v11 = vmax.f32 %v2171_v4, 0.0  ;;  %v1041_v12 = vmax.f32 %v2173_v5, 0.0  ;;  %v2401_v0 = vld [vmem:[%s3100_s7 + $0x48] sm:$0xff]   ;;  %v2402_v1 = vld [vmem:[%s3100_s7 + $0x50] sm:$0xff]   ;;  %v2403_v3 = vld [vmem:[%s3100_s7 + $0x58] sm:$0xff]  }
 0x1ea   :  { %v1042_v26 = vpack.c.bf16 %v1038_v27, %v1038_v27  ;;  %v1044_v48 = vpack.c.bf16 %v1040_v8, %v1040_v8  ;;  %v2405_v9 = vld [vmem:[%s3101_s8 + $0x8] sm:$0xff]  }
 0x1eb   :  { %v1043_v29 = vpack.c.bf16 %v1039_v11, %v1039_v11  ;;  %v1045_v13 = vpack.c.bf16 %v1041_v12, %v1041_v12  ;;  %v2069_v10 = vld [vmem:[%s3095_s2 + $0xa] ss:$0 sm:$0xff] }
 0x1ed   :  { %1288 = vmatprep.mubr.bf16.mxu0 %v1043_v29  ;;  %2056 = vmatprep.mubr.msk.bf16.mxu1 %vm870_vm2, %v1045_v13 }
 0x1ee   :  { %1289 = vmatmul.mubr.bf16.vlgmr.msra.gmra.mrb[4].mxu0 %v1042_v26  ;;  %1329 = vmatmul.mubr.bf16.vlgmr.msra.gmra.mrb[12].mxu1 %v1044_v48 }
 0x1ef   :  { %2129 = vmatprep.mubr.msk.f32.mxu0 %vm2432_vm3, %v2431_v14  ;;  %2148 = vmatprep.mubr.msk.bf16.mxu1 %vm2432_vm3, %v2431_v14 }
 0x1f0   :  { %2133 = vmatpush3.bf16.msra.mxu1 %v2384_v32 }
 0x1f1   :  { %2134 = vmatprep.subr.bf16.mxu1 %v2431_v14 }
 0x1f4   :  { %2135 = vmatpush3.bf16.msra.mxu1 %v2385_v33 }
 0x1f5   :  { %2136 = vmatprep.subr.bf16.mxu1 %v2431_v14 }
 0x1f8   :  { %2137 = vmatpush3.bf16.msra.mxu1 %v2386_v34 }
 0x1f9   :  { %2138 = vmatprep.subr.bf16.mxu1 %v2431_v14 }
 0x1fc   :  { %2139 = vmatpush3.bf16.msra.mxu1 %v2387_v35 }
 0x1fd   :  { %2140 = vmatprep.subr.bf16.mxu1 %v2431_v14 }
 0x200   :  { %2141 = vmatpush3.bf16.msra.mxu1 %v2388_v36 }
 0x201   :  { %2142 = vmatprep.subr.bf16.mxu1 %v2431_v14 }
 0x204   :  { %2143 = vmatpush3.bf16.msra.mxu1 %v2389_v37 }
 0x205   :  { %2144 = vmatprep.subr.bf16.mxu1 %v2431_v14 }
 0x208   :  { %2145 = vmatpush3.bf16.msra.mxu1 %v2390_v38 }
 0x209   :  { %2146 = vmatprep.subr.bf16.mxu1 %v2431_v14 }
 0x20c   :  { %2147 = vmatpush3.bf16.msra.mxu1 %v2391_v39 }
 0x2c1   :  { %v2103_v15 = vpop.f32.mrb[4].mxu0  ;;  %v1330_v16 = vpop.f32.mrb[12].mxu1 }
 0x2c2   :  { %v2104_v18 = vpop.f32.mrb[5].mxu0  ;;  %v1332_v19 = vpop.f32.mrb[13].mxu1 }
 0x2c3   :  { %v2105_v20 = vadd.f32 %v2104_v18, %v2103_v15  ;;  %v2106_v21 = vpop.f32.mrb[6].mxu0  ;;  %v1333_v22 = vpop.f32.mrb[14].mxu1 }
 0x2c4   :  { %v2107_v23 = vpop.f32.mrb[7].mxu0  ;;  %v1334_v24 = vpop.f32.mrb[15].mxu1 }
 0x2c5   :  { %v1291_v25 = vadd.f32 %v2105_v20, %v2030_v17 }
 0x2c7   :  { %v1331_v28 = vadd.f32 %v1330_v16, %v1291_v25 }
 0x2c9   :  { %v1336_v30 = vmax.f32 %v1331_v28, 0.0 }
 0x2cb   :  { %2128 = vmatpush3.msra.mxu0 %v1336_v30 }
 0x2cc   :  { %2130 = vmatmul.mubr.msk.f32.vlgmr.msra.gmra.mrb[8].mxu0 %vm1338_vm4, %v1337_v31  ;;  %2152 = vmatprep.subr.mxu0 %v2431_v14 }
 0x2cd   :  { %2154 = vmatprep.mubr.msk.f32.mxu0 %vm2432_vm3, %v2431_v14 }
 0x39f   :  { %v1408_v40 = vpop.f32.mrb[8].mxu0 }
 0x3a0   :  { %1413 = vrot.lane.b32.xlu0 %v1408_v40, %s2433_s12  ;;  %v2131_v41 = vpop.f32.mrb[9].mxu0 }
 0x412   :  { %v1414_v42 = vpop.permute.xlu0 %1413 }
 0x413   :  { %v1417_v43 = vsel %vm1416_vm5, %v1336_v30, %v1414_v42 }
 0x414   :  { %v1418_v44 = vpack.c.bf16 %v1417_v43, %v1417_v43 }
 0x416   :  { %2149 = vmatmul.mubr.bf16.vlgmr.msra.gmra.mrb[16].mxu1 %v1418_v44 }
 0x4e9   :  { %v1524_v46 = vpop.f32.mrb[16].mxu1 }
 0x4ea   :  { %v1525_v47 = vadd.f32 %v2058_v45, %v1524_v46  ;;  %v2150_v49 = vpop.f32.mrb[17].mxu1 }
 0x4eb   :  { %v1527_v50 = vpop.f32.mrb[18].mxu1 }
 0x4ec   :  { %v1530_v51 = vmax.f32 %v1525_v47, 0.0  ;;  %v2151_v52 = vpop.f32.mrb[19].mxu1 }
 0x4ee   :  { %2153 = vmatpush3.msra.mxu0 %v1530_v51 }
 0x4ef   :  { %2155 = vmatmul.mubr.msk.f32.vlgmr.msra.gmra.mrb[10].mxu0 %vm1338_vm4, %v1337_v31  ;;  %2157 = vmatprep.subr.mxu0 %v2431_v14 }
 0x4f0   :  { %2159 = vmatprep.mubr.msk.f32.mxu0 %vm2432_vm3, %v2431_v14 }
 0x5c2   :  { %v1597_v54 = vpop.f32.mrb[10].mxu0 }
 0x5c3   :  { %1672 = vrot.lane.b32.xlu0 %v1597_v54, %s2433_s12  ;;  %2158 = vmatpush3.msra.mxu0 %v1597_v54  ;;  %v2156_v55 = vpop.f32.mrb[11].mxu0 }
 0x5c4   :  { %2160 = vmatmul.mubr.msk.f32.vlgmr.msra.gmra.mrb[12].mxu0 %vm1338_vm4, %v1337_v31  ;;  %1784 = vmatprep.subr.bf16.mxu0 %v2430_v2 }
 0x5c5   :  { %1785 = vmatpush1.bf16.msra.mxu0 %v2392_v53 }
 0x5c6   :  { %1786 = vmatprep.subr.bf16.mxu0 %v2430_v2 }
 0x5c9   :  { %1787 = vmatpush1.bf16.msra.mxu0 %v2393_v56 }
 0x5ca   :  { %1788 = vmatprep.subr.bf16.mxu0 %v2430_v2 }
 0x5cd   :  { %1789 = vmatpush1.bf16.msra.mxu0 %v2394_v57 }
 0x5ce   :  { %1790 = vmatprep.subr.bf16.mxu0 %v2430_v2 }
 0x5d1   :  { %1791 = vmatpush1.bf16.msra.mxu0 %v2395_v58 }
 0x5d2   :  { %1792 = vmatprep.subr.bf16.mxu0 %v2430_v2 }
 0x5d5   :  { %1793 = vmatpush1.bf16.msra.mxu0 %v2396_v59 }
 0x5d6   :  { %1794 = vmatprep.subr.bf16.mxu0 %v2430_v2 }
 0x5d9   :  { %1795 = vmatpush1.bf16.msra.mxu0 %v2397_v60 }
 0x5da   :  { %1796 = vmatprep.subr.bf16.mxu0 %v2430_v2 }
 0x5dd   :  { %1797 = vmatpush1.bf16.msra.mxu0 %v2398_v61 }
 0x5de   :  { %1798 = vmatprep.subr.bf16.mxu0 %v2430_v2 }
 0x5e1   :  { %1799 = vmatpush1.bf16.msra.mxu0 %v2399_v62 }
 0x5e2   :  { %1800 = vmatprep.subr.bf16.mxu0 %v2430_v2 }
 0x5e5   :  { %1801 = vmatpush1.bf16.msra.mxu0 %v2400_v63 }
 0x5e6   :  { %1802 = vmatprep.subr.bf16.mxu0 %v2430_v2 }
 0x5e9   :  { %1803 = vmatpush1.bf16.msra.mxu0 %v2401_v0 }
 0x5ea   :  { %1804 = vmatprep.subr.bf16.mxu0 %v2430_v2 }
 0x5ed   :  { %1805 = vmatpush1.bf16.msra.mxu0 %v2402_v1 }
 0x5ee   :  { %1806 = vmatprep.subr.bf16.mxu0 %v2430_v2  ;;  %v2404_v2 = vld [vmem:[%s3101_s8] sm:$0xff]   ;;  %s1900_s8 = sshll.u32 %s2434_s5, 4  ;;  %s1901_s8 = int_to_ptr.vmem [resolvable:$true] %s1900_s8 }
 0x5ef   :  { %s2406_s18 = scalar_lea.vmem %s1901_s8, 128  ;;  %p2411_p1 = scmp.lt.s32.totalorder %s1901_s8, %s1901_s8 }
 0x5f0   :  { %p2407_p0 = scmp.ne.s32.totalorder %s1901_s8, %s2406_s18  ;;  %p2412_p2 = scmp.lt.s32.totalorder %s2406_s18, %s2406_s18 }
 0x5f1   :  { %1807 = vmatpush1.bf16.msra.mxu0 %v2403_v3 }
 0x5f2   :  { %2162 = vmatprep.subr.bf16.mxu0 %v2431_v14  ;;  %p2413_p3 = por %p2412_p2, %p2411_p1 }
 0x5f4   :  { %p2414_p4 = pnand %p2413_p3, %p2407_p0 }
 0x635   :  { %v1673_v4 = vpop.permute.xlu0 %1672 }
 0x636   :  { %v1675_v5 = vsel %vm1416_vm5, %v1530_v51, %v1673_v4 }
 0x637   :  { %v1676_v8 = vpack.c.bf16 %v1675_v5, %v1675_v5 }
 0x697   :  { %v1667_v6 = vpop.f32.mrb[12].mxu0 }
 0x698   :  { %v1677_v7 = vpack.c.bf16 %v1667_v6, %v1667_v6  ;;  %v2161_v27 = vpop.f32.mrb[13].mxu0 }
 0x69a   :  { %2082 = vmatprep.mubr.msk.bf16.mxu0 %vm1416_vm5, %v1677_v7 }
 0x69b   :  { %1817 = vmatmul.mubr.bf16.vlgmr.msra.gmra.mrb[16].mxu0 %v1676_v8 }
 0x69c   :  { %2166 = vmatprep.mubr.msk.bf16.mxu0 %vm2432_vm3, %v2431_v14  ;;  %2163 = vmatpush3.bf16.msra.mxu0 %v2404_v2 }
 0x69d   :  { %2164 = vmatprep.subr.bf16.mxu0 %v2431_v14  ;;  %v2083_v14 = vld [vmem:[%s3095_s2 + $0xb] ss:$0 sm:$0xff] }
 0x6a0   :  { %2165 = vmatpush3.bf16.msra.mxu0 %v2405_v9 }
 0x76e   :  { %v1818_v11 = vpop.f32.mrb[16].mxu0 }
 0x76f   :  { %v1819_v12 = vadd.f32 %v2069_v10, %v1818_v11  ;;  %v1820_v29 = vpop.f32.mrb[17].mxu0 }
 0x770   :  { %v1821_v13 = vpop.f32.mrb[18].mxu0 }
 0x771   :  { %v1824_v26 = vmax.f32 %v1819_v12, 0.0  ;;  %v1822_v48 = vpop.f32.mrb[19].mxu0 }
 0x773   :  { %v1825_v15 = vpack.c.bf16 %v1824_v26, %v1824_v26 }
 0x775   :  { %2167 = vmatmul.mubr.msk.bf16.vlgmr.msra.gmra.mrb[20].mxu0 %vm1849_vm6, %v1825_v15 }
 0x848   :  { %v1887_v16 = vpop.f32.mrb[20].mxu0 }
 0x849   :  { %v1888_v17 = vadd.f32 %v2083_v14, %v1887_v16  ;;  %v2168_v18 = vpop.f32.mrb[21].mxu0 }
 0x84a   :  { %v1890_v19 = vpop.f32.mrb[22].mxu0 }
 0x84b   :  { %1893 = vst [vmem:[#allocation2] sm:$0xff] %v1888_v17  ;;  %v2169_v20 = vpop.f32.mrb[23].mxu0 }
 0x84c   :  { %2417 = shalt.err (!%p2414_p4)
}
 0x84d   :  { %s2418_s2 = scalar_lea.hbm %s3102_s9, 128 }
 0x84e   :  { %p2419_p5 = scmp.ne.s32.totalorder %s3102_s9, %s2418_s2  ;;  %p2422_p6 = scmp.lt.u32.totalorder %s2418_s2, %s3102_s9 }
 0x850   :  { %p2424_p7 = pnand %p2422_p6, %p2419_p5 }
 0x852   :  { %2427 = shalt.err (!%p2424_p7)
}
 0x853   :  { %1903 = dma.vmem_to_hbm [thread:$0]  %s1901_s8, 128, %s3102_s9, [#allocation3]  }
 0x854   :  { %2428 = dma.done.wait [#allocation3], 128  }
 0x855   :  { %2429 = vsyncadd [#allocation3], 4294967168 }
 0x856   :  { %1907 = vsyncpa [#allocation3], 1 }

</bundles_post_ra>
